<compile_context>
chip_gen: v6e
topology: v6e:2x2x1
jax: 0.10.0
libtpu: 0.0.40
codegen_flags: <defaults>
</compile_context>

<pallas_src>
import jax
import jax.numpy as jnp
from jax.experimental import pallas as pl
from jax.experimental.pallas import tpu as pltpu


def _round_up(x, m):
    return (x + m - 1) // m * m


def _cdiv(a, b):
    return -(-a // b)


def atten_emb_kernel(q_ref, cqi_ref, m_ref, wq_ref, wc_ref, wm_ref, b_ref, o_ref):
    # One MXU matmul (tm, Q_inp) @ (Q_inp, hid) -> (tm, hid), plus two rank-1
    # broadcast multiplies and a pre-summed bias add on the VPU (free filler
    # under an HBM-bound kernel).
    acc = jnp.dot(q_ref[...], wq_ref[...], preferred_element_type=jnp.float32)
    acc = acc + cqi_ref[...] * wc_ref[...]   # (tm, 1) * (1, hid)
    acc = acc + m_ref[...] * wm_ref[...]     # (tm, 1) * (1, hid)
    o_ref[...] = acc + b_ref[...]


def _choose_tm(B, tm_max):
    """Pick a row-tile that is a multiple of 8, bounded by tm_max, with at most
    7 rows of padding and >= 2 grid steps for very large batches (v7x megacore)."""
    n_steps = max(1, _cdiv(B, tm_max))
    # Prefer >= 2 grid steps when the batch is big enough to matter, so the
    # "parallel" axis can shard across the 2 TensorCores on v7x (no-op on
    # single-TC v5e/v6e).
    if n_steps == 1 and B > 1024:
        n_steps = 2
    tm = _round_up(_cdiv(B, n_steps), 8)
    return tm


def atten_emb(Q, cqi, m, params, *, tm_max=4096):
    """Q: (B, Q_inp), cqi: (B, 1), m: (B, 1) -> (B, hid) float32."""
    B, Q_inp = Q.shape
    hid = params["wq_t"].shape[1]

    # Pre-sum the three biases at trace time (tiny, one-off).
    bias = params["bq"] + params["bc"] + params["bm"]          # (1, hid)

    tm = _choose_tm(B, tm_max)
    grid = (_cdiv(B, tm),)

    flops = 2 * B * Q_inp * hid + 4 * B * hid
    bytes_accessed = 4 * (B * Q_inp + 2 * B + (Q_inp + 3) * hid + B * hid)

    out = pl.pallas_call(
        atten_emb_kernel,
        out_shape=jax.ShapeDtypeStruct((B, hid), jnp.float32),
        grid=grid,
        in_specs=[
            pl.BlockSpec((tm, Q_inp), lambda i: (i, 0)),   # Q tiles stream through
            pl.BlockSpec((tm, 1), lambda i: (i, 0)),       # cqi tiles
            pl.BlockSpec((tm, 1), lambda i: (i, 0)),       # m tiles
            pl.BlockSpec((Q_inp, hid), lambda i: (0, 0)),  # W_Q^T: VMEM-resident
            pl.BlockSpec((1, hid), lambda i: (0, 0)),      # W_cqi row: VMEM-resident
            pl.BlockSpec((1, hid), lambda i: (0, 0)),      # W_m row: VMEM-resident
            pl.BlockSpec((1, hid), lambda i: (0, 0)),      # pre-summed bias
        ],
        out_specs=pl.BlockSpec((tm, hid), lambda i: (i, 0)),
        compiler_params=pltpu.CompilerParams(
            dimension_semantics=("parallel",),             # megacore / 2-TC sharding
        ),
        cost_estimate=pl.CostEstimate(
            flops=flops, transcendentals=0, bytes_accessed=bytes_accessed
        ),
    )(Q, cqi, m, params["wq_t"], params["wc"], params["wm"], bias)

    return out


def init_params(key, hid, Q_inp):
    """Deterministic init mimicking nn.Linear default (uniform +- 1/sqrt(fan_in))."""
    ks = jax.random.split(key, 6)

    def u(k, shape, fan_in):
        bound = 1.0 / jnp.sqrt(jnp.float32(fan_in))
        return jax.random.uniform(k, shape, jnp.float32, -bound, bound)

    # PyTorch stores W as (out, in); we keep transposed / row layouts.
    return {
        "wq_t": u(ks[0], (Q_inp, hid), Q_inp),   # W_Q^T
        "bq":   u(ks[1], (1, hid), Q_inp),
        "wc":   u(ks[2], (1, hid), 1),           # W_cqi row (== W_cqi^T)
        "bc":   u(ks[3], (1, hid), 1),
        "wm":   u(ks[4], (1, hid), 1),           # W_m row
        "bm":   u(ks[5], (1, hid), 1),
    }


def atten_emb_ref(Q, cqi, m, p):
    return (m @ p["wm"] + p["bm"]) + (cqi @ p["wc"] + p["bc"]) + (Q @ p["wq_t"] + p["bq"])


if __name__ == "__main__":
    hid, Q_inp, B = 32, 16, 8   # small shapes consistent with the module

    key = jax.random.PRNGKey(0)
    kp, kq, kc, km = jax.random.split(key, 4)
    params = init_params(kp, hid, Q_inp)

    Q = jax.random.normal(kq, (B, Q_inp), jnp.float32)
    cqi = jax.random.normal(kc, (B, 1), jnp.float32)
    m = jax.random.normal(km, (B, 1), jnp.float32)

    out = jax.block_until_ready(atten_emb(Q, cqi, m, params))
    ref = atten_emb_ref(Q, cqi, m, params)

    assert out.shape == (B, hid)
    assert jnp.allclose(out, ref, atol=1e-5, rtol=1e-5)

    # Also exercise a non-multiple-of-8 batch (partial last block) and a
    # batch large enough to take >1 grid step.
    B2 = 1030
    kq2, kc2, km2 = jax.random.split(jax.random.PRNGKey(1), 3)
    Q2 = jax.random.normal(kq2, (B2, Q_inp), jnp.float32)
    cqi2 = jax.random.normal(kc2, (B2, 1), jnp.float32)
    m2 = jax.random.normal(km2, (B2, 1), jnp.float32)
    out2 = jax.block_until_ready(atten_emb(Q2, cqi2, m2, params, tm_max=512))
    ref2 = atten_emb_ref(Q2, cqi2, m2, params)
    assert out2.shape == (B2, hid)
    assert jnp.allclose(out2, ref2, atol=1e-4, rtol=1e-4)

    print("KERNEL_OK")
</pallas_src>

<mosaic_0001>
module attributes {stable_mosaic.version = 11 : i64} {
  func.func @atten_emb_kernel(%arg0: i32, %arg1: memref<8x16xf32, #tpu.memory_space<vmem>>, %arg2: memref<8x1xf32, #tpu.memory_space<vmem>>, %arg3: memref<8x1xf32, #tpu.memory_space<vmem>>, %arg4: memref<16x32xf32, #tpu.memory_space<vmem>>, %arg5: memref<1x32xf32, #tpu.memory_space<vmem>>, %arg6: memref<1x32xf32, #tpu.memory_space<vmem>>, %arg7: memref<1x32xf32, #tpu.memory_space<vmem>>, %arg8: memref<8x32xf32, #tpu.memory_space<vmem>>) attributes {dimension_semantics = [#tpu.dimension_semantics<parallel>], iteration_bounds = array<i64: 1>, scalar_prefetch = 0 : i64, scratch_operands = 0 : i64, tpu.core_type = #tpu.core_type<tc>, window_params = [{transform_indices = @transform_0, window_bounds = array<i64: 8, 16>}, {transform_indices = @transform_1, window_bounds = array<i64: 8, 1>}, {transform_indices = @transform_2, window_bounds = array<i64: 8, 1>}, {pipeline_mode = #tpu.pipeline_mode<synchronous>, transform_indices = @transform_3, window_bounds = array<i64: 16, 32>}, {pipeline_mode = #tpu.pipeline_mode<synchronous>, transform_indices = @transform_4, window_bounds = array<i64: 1, 32>}, {pipeline_mode = #tpu.pipeline_mode<synchronous>, transform_indices = @transform_5, window_bounds = array<i64: 1, 32>}, {pipeline_mode = #tpu.pipeline_mode<synchronous>, transform_indices = @transform_6, window_bounds = array<i64: 1, 32>}, {transform_indices = @transform_7, window_bounds = array<i64: 8, 32>}]} {
    %c0 = arith.constant 0 : index
    %c0_0 = arith.constant 0 : index
    %0 = vector.load %arg1[%c0, %c0_0] : memref<8x16xf32, #tpu.memory_space<vmem>>, vector<8x16xf32>
    %c0_1 = arith.constant 0 : index
    %c0_2 = arith.constant 0 : index
    %1 = vector.load %arg4[%c0_1, %c0_2] : memref<16x32xf32, #tpu.memory_space<vmem>>, vector<16x32xf32>
    %cst = arith.constant dense<0.000000e+00> : vector<8x32xf32>
    %2 = tpu.matmul %0, %1, %cst {dimension_numbers = #tpu.dot_dimension_numbers<[1], [0], [0], [1], [0, 0, 1, 1], [], []>} : vector<8x16xf32>, vector<16x32xf32>, vector<8x32xf32> -> vector<8x32xf32>
    %c0_3 = arith.constant 0 : index
    %c0_4 = arith.constant 0 : index
    %3 = vector.load %arg2[%c0_3, %c0_4] : memref<8x1xf32, #tpu.memory_space<vmem>>, vector<8x1xf32>
    %c0_5 = arith.constant 0 : index
    %c0_6 = arith.constant 0 : index
    %4 = vector.load %arg5[%c0_5, %c0_6] : memref<1x32xf32, #tpu.memory_space<vmem>>, vector<1x32xf32>
    %5 = vector.broadcast %3 : vector<8x1xf32> to vector<8x32xf32>
    %6 = vector.broadcast %4 : vector<1x32xf32> to vector<8x32xf32>
    %7 = arith.mulf %5, %6 : vector<8x32xf32>
    %8 = arith.addf %2, %7 : vector<8x32xf32>
    %c0_7 = arith.constant 0 : index
    %c0_8 = arith.constant 0 : index
    %9 = vector.load %arg3[%c0_7, %c0_8] : memref<8x1xf32, #tpu.memory_space<vmem>>, vector<8x1xf32>
    %c0_9 = arith.constant 0 : index
    %c0_10 = arith.constant 0 : index
    %10 = vector.load %arg6[%c0_9, %c0_10] : memref<1x32xf32, #tpu.memory_space<vmem>>, vector<1x32xf32>
    %11 = vector.broadcast %9 : vector<8x1xf32> to vector<8x32xf32>
    %12 = vector.broadcast %10 : vector<1x32xf32> to vector<8x32xf32>
    %13 = arith.mulf %11, %12 : vector<8x32xf32>
    %14 = arith.addf %8, %13 : vector<8x32xf32>
    %c0_11 = arith.constant 0 : index
    %c0_12 = arith.constant 0 : index
    %15 = vector.load %arg7[%c0_11, %c0_12] : memref<1x32xf32, #tpu.memory_space<vmem>>, vector<1x32xf32>
    %16 = vector.broadcast %15 : vector<1x32xf32> to vector<8x32xf32>
    %17 = arith.addf %14, %16 : vector<8x32xf32>
    %c0_13 = arith.constant 0 : index
    %c0_14 = arith.constant 0 : index
    %18 = vector.load %arg8[%c0_13, %c0_14] : memref<8x32xf32, #tpu.memory_space<vmem>>, vector<8x32xf32>
    tpu.vector_store %arg8[%c0_13, %c0_14], %17 {strides = array<i32>} : memref<8x32xf32, #tpu.memory_space<vmem>>, vector<8x32xf32>,
    return
  }
  func.func @transform_0(%arg0: i32) -> (i32, i32) {
    %c0_i32 = arith.constant 0 : i32
    %c0_i32_0 = arith.constant 0 : i32
    return %arg0, %c0_i32 : i32, i32
  }
  func.func @transform_1(%arg0: i32) -> (i32, i32) {
    %c0_i32 = arith.constant 0 : i32
    %c0_i32_0 = arith.constant 0 : i32
    return %arg0, %c0_i32 : i32, i32
  }
  func.func @transform_2(%arg0: i32) -> (i32, i32) {
    %c0_i32 = arith.constant 0 : i32
    %c0_i32_0 = arith.constant 0 : i32
    return %arg0, %c0_i32 : i32, i32
  }
  func.func @transform_3(%arg0: i32) -> (i32, i32) {
    %c0_i32 = arith.constant 0 : i32
    %c0_i32_0 = arith.constant 0 : i32
    %c0_i32_1 = arith.constant 0 : i32
    return %c0_i32, %c0_i32_0 : i32, i32
  }
  func.func @transform_4(%arg0: i32) -> (i32, i32) {
    %c0_i32 = arith.constant 0 : i32
    %c0_i32_0 = arith.constant 0 : i32
    %c0_i32_1 = arith.constant 0 : i32
    return %c0_i32, %c0_i32_0 : i32, i32
  }
  func.func @transform_5(%arg0: i32) -> (i32, i32) {
    %c0_i32 = arith.constant 0 : i32
    %c0_i32_0 = arith.constant 0 : i32
    %c0_i32_1 = arith.constant 0 : i32
    return %c0_i32, %c0_i32_0 : i32, i32
  }
  func.func @transform_6(%arg0: i32) -> (i32, i32) {
    %c0_i32 = arith.constant 0 : i32
    %c0_i32_0 = arith.constant 0 : i32
    %c0_i32_1 = arith.constant 0 : i32
    return %c0_i32, %c0_i32_0 : i32, i32
  }
  func.func @transform_7(%arg0: i32) -> (i32, i32) {
    %c0_i32 = arith.constant 0 : i32
    %c0_i32_0 = arith.constant 0 : i32
    return %arg0, %c0_i32 : i32, i32
  }
}

</mosaic_0001>

<bundles_post_ra>
// kernel: tpu_custom_call.1
= control target key start
LH: loop header
LB: loop body
LE: loop exit
PB: predicated region body
PF: predicated region fallthrough
CT: control target
= control target key end

     0   :  { %12 = vsyncpa [#allocation3], 0  ;;  %s306_s0 = inlined_call_operand.hbm [shape: f32[8,16], index: 0, kind: input, shape index: {}]   ;;  %s307_s1 = inlined_call_operand.vmem [shape: f32[8,1], index: 1, kind: input, shape index: {}]   ;;  %s308_s2 = inlined_call_operand.vmem [shape: f32[8,1], index: 2, kind: input, shape index: {}]   ;;  %s309_s3 = inlined_call_operand.vmem [shape: f32[16,32], index: 3, kind: input, shape index: {}]   ;;  %s310_s4 = inlined_call_operand.vmem [shape: f32[1,32], index: 4, kind: input, shape index: {}]   ;;  %s311_s5 = inlined_call_operand.vmem [shape: f32[1,32], index: 5, kind: input, shape index: {}]   ;;  %s312_s6 = inlined_call_operand.vmem [shape: f32[1,32], index: 6, kind: input, shape index: {}]   ;;  %s313_s7 = inlined_call_operand.hbm [shape: f32[8,32], index: 7, kind: output, shape index: {}]  }
   0x1   :  { %13 = vsyncpa [#allocation4], 0  ;;  %s234_s24 = smov [#allocation2]  }
   0x2   :  { %s20_s25 = sshll.u32 %s234_s24, 4  ;;  %s21_s25 = int_to_ptr.vmem [resolvable:$true] %s20_s25 }
   0x3   :  { %s198_s26 = scalar_lea.vmem %s21_s25, 128  ;;  %p203_p1 = scmp.lt.s32.totalorder %s21_s25, %s21_s25 }
   0x4   :  { %p199_p0 = scmp.ne.s32.totalorder %s21_s25, %s198_s26  ;;  %p204_p2 = scmp.lt.s32.totalorder %s198_s26, %s198_s26 }
   0x6   :  { %p205_p3 = por %p204_p2, %p203_p1 }
   0x8   :  { %p206_p4 = pnand %p205_p3, %p199_p0 }
   0xa   :  { %209 = shalt.err (!%p206_p4)
}
   0xb   :  { %23 = dma.hbm_to_vmem [thread:$0]  %s306_s0, 128, %s21_s25, [#allocation3]  }
   0xc   :  { %230 = dma.done.wait [#allocation3], 128  }
   0xd   :  { %231 = vsyncadd [#allocation3], 4294967168  ;;  %v235_v0 = vmov 0.0   ;;  %vm236_vm0 = vmmov 0   ;;  %v237_v1 = vmov 0   ;;  %v41_v2 = vld [vmem:[%s309_s3 + $0x8] sm:$0xff] }
   0xe   :  { %177 = vmatprep.subr.mxu0 %v235_v0  ;;  %181 = vmatprep.mubr.msk.f32.mxu0 %vm236_vm0, %v235_v0  ;;  %v40_v3 = vld [vmem:[%s309_s3] sm:$0xff]  ;;  %vm56_vm1 = vcmask 130048   ;;  %vm153_vm2 = vcmask 261120  }
   0xf   :  { %189 = vset.pattern.permute.xlu0 %v237_v1  ;;  %178 = vmatpush3.msra.mxu0 %v41_v2  ;;  %v39_v4 = vld [vmem:[#allocation2] sm:$0xff] }
  0x10   :  { %v42_v5 = vld [vmem:[%s307_s1] sm:$0xff]  ;;  %179 = vmatprep.subr.mxu0 %v235_v0 }
  0x11   :  { %46 = vperm.xlu0 %189, %v42_v5   ;;  %180 = vmatpush3.msra.mxu0 %v40_v3  ;;  %v130_v6 = vld [vmem:[%s308_s2] sm:$0xff]  ;;  %s238_s2 = smov [#allocation5]  }
  0x12   :  { %182 = vmatmul.mubr.msk.f32.vlgmr.msra.gmra.mxu0 %vm56_vm1, %v39_v4  ;;  %v170_v8 = vld [vmem:[%s310_s4] ss:$0 sm:$0xff]  ;;  %s161_s17 = sshll.u32 %s238_s2, 4  ;;  %s162_s17 = int_to_ptr.vmem [resolvable:$true] %s161_s17 }
  0x13   :  { %v172_v9 = vld [vmem:[%s311_s5] ss:$0 sm:$0xff]  ;;  %s210_s4 = scalar_lea.vmem %s162_s17, 128  ;;  %p215_p6 = scmp.lt.s32.totalorder %s162_s17, %s162_s17 }
  0x14   :  { %v173_v15 = vld [vmem:[%s312_s6] ss:$0 sm:$0xff]  ;;  %p211_p5 = scmp.ne.s32.totalorder %s162_s17, %s210_s4  ;;  %p216_p7 = scmp.lt.s32.totalorder %s210_s4, %s210_s4 }
  0x15   :  { %134 = vperm.xlu0 %189, %v130_v6  }
  0x16   :  { %p217_p8 = por %p216_p7, %p215_p6 }
  0x18   :  { %p218_p9 = pnand %p217_p8, %p211_p5 }
  0x8c   :  { %v47_v7 = vpop.permute.xlu0 %46 }
  0x8d   :  { %v55_v11 = vmul.f32 %v170_v8, %v47_v7 }
  0x90   :  { %v135_v10 = vpop.permute.xlu0 %134 }
  0x91   :  { %v143_v13 = vmul.f32 %v172_v9, %v135_v10 }
  0xd2   :  { %v126_v12 = vpop.f32.mrf.mxu0 }
  0xd3   :  { %v127_v14 = vadd.f32 %v126_v12, %v55_v11 }
  0xd4   :  { %v183_v16 = vpop.f32.mrf.mxu0 }
  0xd5   :  { %v144_v17 = vadd.f32 %v143_v13, %v127_v14 }
  0xd7   :  { %v152_v18 = vadd.f32 %v173_v15, %v144_v17 }
  0xd9   :  { %154 = vst.msk [vmem:[#allocation5] sm:$0xff] %vm153_vm2, %v152_v18 }
  0xda   :  { %221 = shalt.err (!%p218_p9)
}
  0xdb   :  { %164 = dma.vmem_to_hbm [thread:$0]  %s162_s17, 128, %s313_s7, [#allocation4]  }
  0xdc   :  { %232 = dma.done.wait [#allocation4], 128  }
  0xdd   :  { %233 = vsyncadd [#allocation4], 4294967168 }
  0xde   :  { %168 = vsyncpa [#allocation3], 1 }
  0xdf   :  { %169 = vsyncpa [#allocation4], 1 }

</bundles_post_ra>
